<compile_context>
chip_gen: v5e
topology: v5e:2x2
jax: 0.10.0
libtpu: 0.0.40
codegen_flags: <defaults>
</compile_context>

<pallas_src>
import functools
import math

import numpy as np
import jax
import jax.numpy as jnp
from jax.experimental import pallas as pl
from jax.experimental.pallas import tpu as pltpu


# Target bytes per pipelined output buffer (double-buffered by Pallas).
_OUT_BUF_BYTES = 4 * 1024 * 1024


def _cdiv(a: int, b: int) -> int:
    return -(-a // b)


def _round_up(x: int, m: int) -> int:
    return (x + m - 1) // m * m


@functools.lru_cache(maxsize=None)
def _tables(dim: int, G: int):
    """Compile-time constant tables, cached on (dim, G) so they are uploaded once.

    Returns:
      S: [G, G*dim] f32.  S[g, g*dim + j] = freqs_full[j], zero elsewhere, where
         freqs_full = [freqs | freqs] (length dim).
      P: [1, G*dim] f32.  P[0, g*dim + j] = 0 for the sin half, pi/2 for cos.
    """
    half = dim // 2
    emb = math.log(10000.0) / (half - 1)
    freqs = np.exp(np.arange(half, dtype=np.float32) * np.float32(-emb)).astype(np.float32)
    freqs_full = np.concatenate([freqs, freqs])                                   # [dim]
    phase = np.concatenate([np.zeros(half, np.float32),
                            np.full(half, np.pi / 2.0, np.float32)])              # [dim]
    W = G * dim
    S = np.zeros((G, W), dtype=np.float32)
    for g in range(G):
        S[g, g * dim:(g + 1) * dim] = freqs_full
    P = np.tile(phase, G).reshape(1, W).astype(np.float32)
    return jnp.asarray(S), jnp.asarray(P)


def _make_kernel(G: int):
    """Kernel: out = sin(sum_g t[:, g:g+1] * S[g:g+1, :] + phase), one lane-dense store."""
    def kernel(t_ref, s_ref, p_ref, o_ref):
        t = t_ref[...]                                  # [tb, G]
        acc = t[:, 0:1] * s_ref[0:1, :]                 # [tb, W] (S is zero outside group 0)
        for g in range(1, G):                           # unrolled at trace time; VPU has slack
            acc = acc + t[:, g:g + 1] * s_ref[g:g + 1, :]
        o_ref[...] = jnp.sin(acc + p_ref[...]).astype(o_ref.dtype)
    return kernel


def time_position_embeddings(time: jax.Array, dim: int, *, out_dtype=jnp.float32) -> jax.Array:
    """Pallas equivalent of TimePositionEmbeddings(dim)(time); time is a 1-D [B] array."""
    assert dim % 2 == 0 and dim >= 4, "dim must be even and >= 4"
    B = time.shape[0]

    # Row packing for lane-dense stores when dim < 128.
    if dim < 128 and 128 % dim == 0 and B % (128 // dim) == 0:
        G = 128 // dim
    else:
        G = 1
    W = G * dim
    rows = B // G

    S, P = _tables(dim, G)
    t2 = time.astype(jnp.float32).reshape(rows, G)

    # --- tile size: VMEM-budget aware + megacore aware; no padding, no slicing ---
    out_itemsize = jnp.dtype(out_dtype).itemsize
    row_bytes = W * out_itemsize
    vmem_rows = max(8, (_OUT_BUF_BYTES // row_bytes) // 8 * 8)
    if rows <= 8:
        tb = rows                       # single block; equals full first dim (legal for rows < 8)
    else:
        tb = min(vmem_rows, _round_up(_cdiv(rows, 2), 8))   # >= 2 grid steps -> both v7x cores
    grid = (_cdiv(rows, tb),)

    out = pl.pallas_call(
        _make_kernel(G),
        out_shape=jax.ShapeDtypeStruct((rows, W), out_dtype),
        grid=grid,
        in_specs=[
            pl.BlockSpec((tb, G), lambda i: (i, 0)),     # timestep rows
            pl.BlockSpec((G, W), lambda i: (0, 0)),      # resident masked-freq table
            pl.BlockSpec((1, W), lambda i: (0, 0)),      # resident phase vector
        ],
        out_specs=pl.BlockSpec((tb, W), lambda i: (i, 0)),
        compiler_params=pltpu.CompilerParams(
            dimension_semantics=("parallel",),
            vmem_limit_bytes=32 * 1024 * 1024,           # actual usage ~<= 9 MiB; safe on v5e/v6e/v7x
        ),
        cost_estimate=pl.CostEstimate(
            flops=2 * B * dim,
            transcendentals=B * dim,
            bytes_accessed=B * 4 + (G + 1) * W * 4 + B * dim * out_itemsize,
        ),
    )(t2, S, P)

    # Free row-major view back to the module's [B, dim] layout.
    return out.reshape(B, dim)


def _reference(time: jax.Array, dim: int) -> jax.Array:
    half_dim = dim // 2
    emb = math.log(10000.0) / (half_dim - 1)
    emb = jnp.exp(jnp.arange(half_dim, dtype=jnp.float32) * -emb)
    emb = time.astype(jnp.float32)[:, None] * emb[None, :]
    return jnp.concatenate([jnp.sin(emb), jnp.cos(emb)], axis=-1)


if __name__ == "__main__":
    key = jax.random.PRNGKey(0)
    k1, k2 = jax.random.split(key)

    # Config 1: dim < 128 -> packed lane-dense path (G = 2, one 128-lane store per 2 rows).
    batch, dim = 8, 64
    t1 = jax.random.randint(k1, (batch,), minval=0, maxval=1000).astype(jnp.float32)
    out1 = jax.block_until_ready(time_position_embeddings(t1, dim))
    ref1 = _reference(t1, dim)
    assert out1.shape == (batch, dim) and out1.dtype == jnp.float32
    # Arguments reach ~1000 rad; f32 range reduction in sin / sin(x+pi/2) gives ~1e-4 deviation.
    assert jnp.allclose(out1, ref1, atol=5e-3, rtol=5e-3), "mismatch vs reference (packed path)"

    # Config 2: dim >= 128 -> unpacked path, ragged last grid block (no pad / no output copy).
    batch2, dim2 = 12, 128
    t2 = jax.random.randint(k2, (batch2,), minval=0, maxval=1000).astype(jnp.float32)
    out2 = jax.block_until_ready(time_position_embeddings(t2, dim2))
    ref2 = _reference(t2, dim2)
    assert out2.shape == (batch2, dim2)
    assert jnp.allclose(out2, ref2, atol=5e-3, rtol=5e-3), "mismatch vs reference (ragged path)"

    print("KERNEL_OK")
</pallas_src>

<mosaic_0001>
module attributes {stable_mosaic.version = 11 : i64} {
  func.func @kernel(%arg0: i32, %arg1: memref<4x2xf32, #tpu.memory_space<vmem>>, %arg2: memref<2x128xf32, #tpu.memory_space<vmem>>, %arg3: memref<1x128xf32, #tpu.memory_space<vmem>>, %arg4: memref<4x128xf32, #tpu.memory_space<vmem>>) attributes {dimension_semantics = [#tpu.dimension_semantics<parallel>], iteration_bounds = array<i64: 1>, scalar_prefetch = 0 : i64, scratch_operands = 0 : i64, tpu.core_type = #tpu.core_type<tc>, window_params = [{transform_indices = @transform_0, window_bounds = array<i64: 4, 2>}, {pipeline_mode = #tpu.pipeline_mode<synchronous>, transform_indices = @transform_1, window_bounds = array<i64: 2, 128>}, {pipeline_mode = #tpu.pipeline_mode<synchronous>, transform_indices = @transform_2, window_bounds = array<i64: 1, 128>}, {transform_indices = @transform_3, window_bounds = array<i64: 4, 128>}]} {
    %c0 = arith.constant 0 : index
    %c0_0 = arith.constant 0 : index
    %0 = vector.load %arg1[%c0, %c0_0] : memref<4x2xf32, #tpu.memory_space<vmem>>, vector<4x2xf32>
    %1 = vector.extract_strided_slice %0 {offsets = [0, 0], sizes = [4, 1], strides = [1, 1]} : vector<4x2xf32> to vector<4x1xf32>
    %c0_1 = arith.constant 0 : index
    %c0_2 = arith.constant 0 : index
    %2 = vector.load %arg2[%c0_1, %c0_2] : memref<2x128xf32, #tpu.memory_space<vmem>>, vector<1x128xf32>
    %3 = vector.broadcast %1 : vector<4x1xf32> to vector<4x128xf32>
    %4 = vector.broadcast %2 : vector<1x128xf32> to vector<4x128xf32>
    %5 = arith.mulf %3, %4 : vector<4x128xf32>
    %6 = vector.extract_strided_slice %0 {offsets = [0, 1], sizes = [4, 1], strides = [1, 1]} : vector<4x2xf32> to vector<4x1xf32>
    %c1 = arith.constant 1 : index
    %c0_3 = arith.constant 0 : index
    %7 = vector.load %arg2[%c1, %c0_3] : memref<2x128xf32, #tpu.memory_space<vmem>>, vector<1x128xf32>
    %8 = vector.broadcast %6 : vector<4x1xf32> to vector<4x128xf32>
    %9 = vector.broadcast %7 : vector<1x128xf32> to vector<4x128xf32>
    %10 = arith.mulf %8, %9 : vector<4x128xf32>
    %11 = arith.addf %5, %10 : vector<4x128xf32>
    %c0_4 = arith.constant 0 : index
    %c0_5 = arith.constant 0 : index
    %12 = vector.load %arg3[%c0_4, %c0_5] : memref<1x128xf32, #tpu.memory_space<vmem>>, vector<1x128xf32>
    %13 = vector.broadcast %12 : vector<1x128xf32> to vector<4x128xf32>
    %14 = arith.addf %11, %13 : vector<4x128xf32>
    %15 = math.sin %14 : vector<4x128xf32>
    %c0_6 = arith.constant 0 : index
    %c0_7 = arith.constant 0 : index
    %16 = vector.load %arg4[%c0_6, %c0_7] : memref<4x128xf32, #tpu.memory_space<vmem>>, vector<4x128xf32>
    tpu.vector_store %arg4[%c0_6, %c0_7], %15 {strides = array<i32>} : memref<4x128xf32, #tpu.memory_space<vmem>>, vector<4x128xf32>,
    return
  }
  func.func @transform_0(%arg0: i32) -> (i32, i32) {
    %c0_i32 = arith.constant 0 : i32
    %c0_i32_0 = arith.constant 0 : i32
    return %arg0, %c0_i32 : i32, i32
  }
  func.func @transform_1(%arg0: i32) -> (i32, i32) {
    %c0_i32 = arith.constant 0 : i32
    %c0_i32_0 = arith.constant 0 : i32
    %c0_i32_1 = arith.constant 0 : i32
    return %c0_i32, %c0_i32_0 : i32, i32
  }
  func.func @transform_2(%arg0: i32) -> (i32, i32) {
    %c0_i32 = arith.constant 0 : i32
    %c0_i32_0 = arith.constant 0 : i32
    %c0_i32_1 = arith.constant 0 : i32
    return %c0_i32, %c0_i32_0 : i32, i32
  }
  func.func @transform_3(%arg0: i32) -> (i32, i32) {
    %c0_i32 = arith.constant 0 : i32
    %c0_i32_0 = arith.constant 0 : i32
    return %arg0, %c0_i32 : i32, i32
  }
}

</mosaic_0001>

<bundles_post_ra>
// kernel: tpu_custom_call.1
= control target key start
LH: loop header
LB: loop body
LE: loop exit
PB: predicated region body
PF: predicated region fallthrough
CT: control target
= control target key end

     0   :  { %v252_v1 = vmov 0   ;;  %s355_s0 = inlined_call_operand.vmem [shape: f32[4,2], index: 0, kind: input, shape index: {}]   ;;  %s356_s1 = inlined_call_operand.vmem [shape: f32[2,128], index: 1, kind: input, shape index: {}]   ;;  %s357_s2 = inlined_call_operand.vmem [shape: f32[1,128], index: 2, kind: input, shape index: {}]   ;;  %s358_s3 = inlined_call_operand.hbm [shape: f32[4,128], index: 3, kind: output, shape index: {}]  }
   0x1   :  { %v15_v0 = vld [vmem:[%s355_s0] sm:$0xf]  ;;  %221 = vset.pattern.permute.xlu0 %v252_v1 }
   0x2   :  { %19 = vperm.xlu0 %221, %v15_v0  }
   0x3   :  { %8 = vsyncpa [#allocation3], 0  ;;  %v253_v2 = vmov 1   ;;  %v223_v4 = vld [vmem:[%s356_s1] ss:$0 sm:$0xff]  ;;  %s200_s21 = sshll.u32 %s358_s3, 4  ;;  %s201_s21 = int_to_ptr.hbm [resolvable:$true] %s200_s21 }
   0x4   :  { %v224_v5 = vld [vmem:[%s356_s1 + $0x1] ss:$0 sm:$0xff]  ;;  %v225_v8 = vld [vmem:[%s357_s2] ss:$0 sm:$0xff]  ;;  %v254_v23 = vmov 2102212464  }
   0x5   :  { %v255_v25 = vmov 920167782   ;;  %v256_v28 = vmov 1326507024   ;;  %v257_v30 = vmov 683565275  }
   0x6   :  { %v258_v32 = vmov 2475754826   ;;  %v259_v35 = vmov 2131351028   ;;  %s260_s1 = smov [#allocation2]  }
   0x7   :  { %s198_s2 = sshll.u32 %s260_s1, 4  ;;  %s199_s2 = int_to_ptr.vmem [resolvable:$true] %s198_s2 }
   0xa   :  { %222 = vset.pattern.permute.xlu0 %v253_v2 }
   0xb   :  { %26 = vperm.xlu0 %222, %v15_v0  }
  0x74   :  { %v20_v3 = vpop.permute.xlu0 %19 }
  0x75   :  { %v23_v7 = vmul.f32 %v223_v4, %v20_v3 }
  0x7d   :  { %v27_v6 = vpop.permute.xlu0 %26 }
  0x7e   :  { %v30_v9 = vmul.f32 %v224_v5, %v27_v6 }
  0x80   :  { %v31_v10 = vadd.f32 %v30_v9, %v23_v7 }
  0x82   :  { %v294_v11 = vadd.f32 %v225_v8, %v31_v10 }
  0x84   :  { %v40_v12 = vand.u32 2139095040, %v294_v11  ;;  %v37_v15 = vand.u32 2147483647, %v294_v11  ;;  %vm39_vm12 = vcmp.lt.s32.totalorder %v294_v11, 0 }
  0x86   :  { %v41_v13 = vshrl.u32 %v40_v12, 23  ;;  %v44_v17 = vand.u32 8388607, %v37_v15  ;;  %vm38_vm13 = vcmp.le.f32.partialorder %v37_v15, 0.7853982 }
  0x88   :  { %v209_v14 = vadd.s32 4294967169, %v41_v13  ;;  %v45_v21 = vor.u32 8388608, %v44_v17 }
  0x8a   :  { %v47_v16 = vadd.s32 1, %v209_v14  ;;  %v309_v42 = vshll.u32 %v45_v21, 8 }
  0x8c   :  { %vm48_vm0 = vcmp.gt.s32.totalorder %v47_v16, 0  ;;  %v86_v52 = vand.u32 65535, %v309_v42  ;;  %v87_v54 = vshrl.u32 %v309_v42, 16 }
  0x8d   :  { %v49_v18 = vsel %vm48_vm0, %v47_v16, 0 }
  0x8e   :  { %v51_v19 = vand.u32 31, %v49_v18  ;;  %v302_v22 = vshrl.u32 %v49_v18, 5 }
  0x90   :  { %v300_v20 = vsub.s32 32, %v51_v19  ;;  %v63_v24 = vshll.u32 %v254_v23, %v51_v19  ;;  %v66_v26 = vshll.u32 %v255_v25, %v51_v19  ;;  %v54_v31 = vshll.u32 %v257_v30, %v51_v19 }
  0x91   :  { %v57_v34 = vshll.u32 %v258_v32, %v51_v19  ;;  %v60_v37 = vshll.u32 %v259_v35, %v51_v19  ;;  %vm72_vm1 = vcmp.lt.s32.totalorder %v302_v22, 4  ;;  %vm69_vm2 = vcmp.lt.s32.totalorder %v302_v22, 1 }
  0x92   :  { %v64_v27 = vshrl.u32 %v255_v25, %v300_v20  ;;  %v67_v29 = vshrl.u32 %v256_v28, %v300_v20  ;;  %v55_v33 = vshrl.u32 %v258_v32, %v300_v20  ;;  %v58_v36 = vshrl.u32 %v259_v35, %v300_v20 }
  0x93   :  { %v61_v38 = vshrl.u32 %v254_v23, %v300_v20  ;;  %vm71_vm3 = vcmp.lt.s32.totalorder %v302_v22, 3  ;;  %vm70_vm4 = vcmp.lt.s32.totalorder %v302_v22, 2  ;;  %v53_v16 = vshrl.u32 %v257_v30, %v300_v20 }
  0x94   :  { %v65_v39 = vor.u32 %v64_v27, %v63_v24  ;;  %v68_v40 = vor.u32 %v67_v29, %v66_v26  ;;  %v56_v41 = vor.u32 %v55_v33, %v54_v31  ;;  %v59_v43 = vor.u32 %v58_v36, %v57_v34 }
  0x95   :  { %v62_v44 = vor.u32 %v61_v38, %v60_v37 }
  0x96   :  { %v78_v45 = vsel %vm72_vm1, %v65_v39, 920167782  ;;  %v82_v46 = vsel %vm72_vm1, %v68_v40, 1326507024  ;;  %v77_v47 = vsel %vm69_vm2, %v56_v41, %v59_v43  ;;  %v73_v24 = vsel %vm69_vm2, %v53_v16, %v56_v41 }
  0x97   :  { %v79_v48 = vsel %vm71_vm3, %v62_v44, %v78_v45  ;;  %v81_v49 = vsel %vm69_vm2, %v59_v43, %v62_v44  ;;  %v83_v51 = vsel %vm71_vm3, %v65_v39, %v82_v46  ;;  %v74_v12 = vsel %vm72_vm1, %v62_v44, 2102212464 }
  0x98   :  { %v80_v50 = vsel %vm70_vm4, %v77_v47, %v79_v48  ;;  %v84_v53 = vsel %vm70_vm4, %v81_v49, %v83_v51  ;;  %v75_v25 = vsel %vm71_vm3, %v59_v43, %v74_v12  ;;  %vm180_vm1 = vweird.f32 %v294_v11 }
  0x99   :  { %v110_v55 = vand.u32 65535, %v80_v50  ;;  %v111_v56 = vshrl.u32 %v80_v50, 16  ;;  %v88_v57 = vand.u32 65535, %v84_v53  ;;  %v89_v58 = vshrl.u32 %v84_v53, 16 }
  0x9a   :  { %v76_v30 = vsel %vm70_vm4, %v73_v24, %v75_v25 }
  0x9b   :  { %v113_v59 = vmul.u32 %v111_v56, %v86_v52  ;;  %v114_v60 = vmul.u32 %v110_v55, %v87_v54  ;;  %v91_v61 = vmul.u32 %v89_v58, %v86_v52  ;;  %v92_v62 = vmul.u32 %v88_v57, %v87_v54 }
  0x9c   :  { %v112_v63 = vmul.u32 %v110_v55, %v86_v52  ;;  %v90_v2 = vmul.u32 %v88_v57, %v86_v52  ;;  %v115_v4 = vmul.u32 %v111_v56, %v87_v54  ;;  %v93_v5 = vmul.u32 %v89_v58, %v87_v54 }
  0x9d   :  { %v116_v0 = vshll.u32 %v113_v59, 16  ;;  %v94_v3 = vshll.u32 %v91_v61, 16  ;;  %v118_v6 = vshll.u32 %v114_v60, 16  ;;  %v96_v8 = vshll.u32 %v92_v62, 16 }
  0x9e   :  { %v117_v21 = vshrl.u32 %v113_v59, 16  ;;  %v95_v26 = vshrl.u32 %v91_v61, 16  ;;  %v119_v28 = vshrl.u32 %v114_v60, 16  ;;  %v97_v31 = vshrl.u32 %v92_v62, 16 }
  0x9f   :  { %vm120_vm5 = vc.u32 %v112_v63, %v116_v0  ;;  %v122_v7 = vadd.s32 %v116_v0, %v112_v63  ;;  %vm98_vm6 = vc.u32 %v90_v2, %v94_v3  ;;  %v100_v9 = vadd.s32 %v94_v3, %v90_v2 }
  0xa0   :  { %v121_v10 = vsel %vm120_vm5, 1, %v252_v1  ;;  %v99_v13 = vsel %vm98_vm6, 1, %v252_v1  ;;  %v130_v35 = vmul.u32 %v309_v42, %v76_v30 }
  0xa1   :  { %v123_v14 = vadd.s32 %v121_v10, %v115_v4  ;;  %vm124_vm7 = vc.u32 %v122_v7, %v118_v6  ;;  %v101_v17 = vadd.s32 %v99_v13, %v93_v5  ;;  %vm102_vm8 = vc.u32 %v100_v9, %v96_v8 }
  0xa2   :  { %v125_v18 = vsel %vm124_vm7, 1, %v252_v1  ;;  %v103_v19 = vsel %vm102_vm8, 1, %v252_v1  ;;  %v126_v1 = vadd.s32 %v122_v7, %v118_v6 }
  0xa3   :  { %v127_v23 = vadd.s32 %v125_v18, %v123_v14  ;;  %v105_v27 = vadd.s32 %v103_v19, %v101_v17 }
  0xa5   :  { %v128_v29 = vadd.s32 %v127_v23, %v117_v21  ;;  %v106_v20 = vadd.s32 %v105_v27, %v95_v26 }
  0xa7   :  { %v129_v32 = vadd.s32 %v128_v29, %v119_v28  ;;  %v107_v33 = vadd.s32 %v106_v20, %v97_v31 }
  0xa9   :  { %v133_v34 = vadd.s32 1, %v129_v32  ;;  %vm132_vm9 = vc.u32 %v107_v33, %v126_v1  ;;  %v131_v47 = vadd.s32 %v126_v1, %v107_v33 }
  0xab   :  { %v134_v36 = vsel %vm132_vm9, %v133_v34, %v129_v32 }
  0xac   :  { %v135_v37 = vadd.s32 %v134_v36, %v130_v35 }
  0xae   :  { %v136_v38 = vadd.s32 536870912, %v135_v37 }
  0xb0   :  { %v137_v39 = vshrl.u32 %v136_v38, 30 }
  0xb2   :  { %v138_v40 = vshll.u32 %v137_v39, 30  ;;  %v161_v60 = vsub.s32 4, %v137_v39 }
  0xb4   :  { %v139_v41 = vsub.s32 %v135_v37, %v138_v40  ;;  %v162_v2 = vsel %vm39_vm12, %v161_v60, %v137_v39 }
  0xb5   :  { %v164_v5 = vsel %vm38_vm13, 0, %v162_v2 }
  0xb6   :  { %vm140_vm10 = vcmp.lt.s32.totalorder %v139_v41, 0  ;;  %v141_v43 = vsub.s32 0, %v139_v41  ;;  %v181_v10 = vadd.s32 3, %v164_v5 }
  0xb8   :  { %v142_v44 = vsel %vm140_vm10, %v141_v43, %v139_v41  ;;  %v182_v16 = vand.u32 3, %v181_v10 }
  0xb9   :  { %v143_v45 = vclz %v142_v44 }
  0xba   :  { %vm184_vm14 = vcmp.eq.s32.totalorder %v182_v16, 0  ;;  %vm187_vm15 = vcmp.eq.s32.totalorder %v182_v16, 2  ;;  %vm183_vm0 = vcmp.lt.s32.totalorder %v182_v16, 2 }
  0xbb   :  { %v210_v46 = vadd.s32 4294967294, %v143_v45 }
  0xbd   :  { %vm211_vm11 = vcmp.lt.s32.totalorder %v210_v46, 0 }
  0xbe   :  { %v146_v22 = vsel %vm211_vm11, 0, %v210_v46 }
  0xbf   :  { %v147_v48 = vsub.s32 32, %v146_v22  ;;  %v151_v49 = vsub.s32 4294967266, %v146_v22  ;;  %v148_v50 = vshll.u32 %v139_v41, %v146_v22 }
  0xc1   :  { %v149_v51 = vshrl.u32 %v131_v47, %v147_v48  ;;  %v152_v42 = vadd.s32 127, %v151_v49 }
  0xc3   :  { %v150_v52 = vor.u32 %v149_v51, %v148_v50  ;;  %v153_v53 = vshll.u32 %v152_v42, 23 }
  0xc5   :  { %v154_v54 = vor.u32 4788187, %v153_v53  ;;  %v157_v56 = vcvt.s32.f32 %v150_v52 }
  0xc7   :  { %v155_v55 = vand.u32 2147483647, %v154_v54 }
  0xc9   :  { %v158_v57 = vmul.f32 %v157_v56, %v155_v55 }
  0xcb   :  { %v159_v58 = vxor.u32 2147483648, %v158_v57 }
  0xcd   :  { %v160_v59 = vsel %vm39_vm12, %v159_v58, %v158_v57 }
  0xce   :  { %v163_v61 = vsel %vm38_vm13, %v294_v11, %v160_v59 }
  0xcf   :  { %v165_v62 = vmul.f32 %v163_v61, %v163_v61 }
  0xd1   :  { %v166_v63 = vmul.f32 -0.001358992, %v165_v62  ;;  %v173_v0 = vmul.f32 -0.00019511016, %v165_v62 }
  0xd3   :  { %v167_v3 = vadd.f32 0.041655596, %v166_v63  ;;  %v174_v4 = vadd.f32 0.008332121, %v173_v0 }
  0xd5   :  { %v168_v6 = vmul.f32 %v167_v3, %v165_v62  ;;  %v175_v7 = vmul.f32 %v174_v4, %v165_v62 }
  0xd7   :  { %v169_v8 = vadd.f32 -0.4999988, %v168_v6  ;;  %v176_v9 = vadd.f32 -0.16666654, %v175_v7 }
  0xd9   :  { %v170_v12 = vmul.f32 %v169_v8, %v165_v62  ;;  %v177_v13 = vmul.f32 %v176_v9, %v165_v62 }
  0xdb   :  { %v171_v14 = vadd.f32 1.0, %v170_v12  ;;  %v178_v15 = vadd.f32 1.0, %v177_v13 }
  0xdd   :  { %v179_v17 = vmul.f32 %v178_v15, %v163_v61  ;;  %v188_v18 = vxor.u32 2147483648, %v171_v14 }
  0xdf   :  { %v185_v19 = vxor.u32 2147483648, %v179_v17  ;;  %v189_v23 = vsel %vm187_vm15, %v188_v18, %v179_v17 }
  0xe1   :  { %v186_v21 = vsel %vm184_vm14, %v171_v14, %v185_v19 }
  0xe2   :  { %v190_v24 = vsel %vm183_vm0, %v186_v21, %v189_v23 }
  0xe3   :  { %v191_v25 = vsel %vm180_vm1, nan, %v190_v24 }
  0xe4   :  { %192 = vst [vmem:[#allocation2] sm:$0xf] %v191_v25 }
  0xe5   :  { %203 = dma.vmem_to_hbm [thread:$0]  %s199_s2, 64, %s201_s21, [#allocation3]  }
  0xe6   :  { %250 = dma.done.wait [#allocation3], 64  }
  0xe7   :  { %251 = vsyncadd [#allocation3], 4294967232 }
  0xe8   :  { %208 = vsyncpa [#allocation3], 1 }

</bundles_post_ra>
